<compile_context>
chip_gen: v6e
topology: v6e:2x2x1
jax: 0.10.0
libtpu: 0.0.40
codegen_flags: <defaults>
</compile_context>

<pallas_src>
import math
from functools import partial

import jax
import jax.numpy as jnp
from jax.experimental import pallas as pl
from jax.experimental.pallas import tpu as pltpu


def _cpe_kernel(x_ref, w_ref, b_ref, o_ref, xp_ref, *, H, W, P, k):
    # x_ref : (1, N, Ct)     unpadded tokens for one (batch, channel-tile)
    # w_ref : (k*k, Ct)      depthwise weights, tap-major, channels on lanes
    # b_ref : (1, Ct)        bias
    # o_ref : (1, N, Ct)
    # xp_ref: (P + N + P, Ct) VMEM scratch: x with P zero halo rows per side
    N = H * W
    Ct = xp_ref.shape[1]
    c = k // 2

    # --- stage the input into the halo'd scratch (VMEM only, no HBM pad) ---
    zero_halo = jnp.zeros((P, Ct), xp_ref.dtype)
    xp_ref[0:P, :] = zero_halo
    xp_ref[P + N:P + N + P, :] = zero_halo
    xv = x_ref[0]                              # (N, Ct), native dtype
    xp_ref[P:P + N, :] = xv

    # --- column masks for the horizontal border (token n sits at col n%W) --
    col = jax.lax.broadcasted_iota(jnp.int32, (N, 1), 0) % W
    col_ok = {}
    for d in range(-c, c + 1):
        if d < 0:
            col_ok[d] = col >= -d              # a column d to the left exists
        elif d > 0:
            col_ok[d] = col < W - d            # a column d to the right exists

    w = w_ref[...].astype(jnp.float32)         # (k*k, Ct)
    b = b_ref[...].astype(jnp.float32)         # (1, Ct)

    # --- centre tap with the bias folded into the accumulator init --------
    ctr = c * k + c
    acc = xv.astype(jnp.float32) * w[ctr:ctr + 1, :] + b

    # --- remaining taps: contiguous static slices of the halo'd scratch ---
    # Flat shift for tap (dy, dx) is (dy-c)*W + (dx-c); the zero halo makes
    # out-of-range rows read as 0, the column masks zero the row-wrap reads.
    for dy in range(k):
        for dx in range(k):
            if dy == c and dx == c:
                continue
            d = dx - c
            s = (dy - c) * W + d
            tap = xp_ref[P + s:P + s + N, :].astype(jnp.float32)
            if d != 0:
                tap = jnp.where(col_ok[d], tap, 0.0)
            acc = acc + tap * w[dy * k + dx:dy * k + dx + 1, :]

    o_ref[0] = acc.astype(o_ref.dtype)


def cpe_forward(x, weight, bias, k=3):
    """CPE forward.

    x:      (B, N, C) with N a perfect square
    weight: (C, 1, k, k)  -- PyTorch depthwise Conv2d weight layout
    bias:   (C,)
    returns (B, N, C)
    """
    B, N, C = x.shape
    side = int(math.sqrt(N))
    assert side * side == N, "N must be a perfect square"
    c = k // 2

    # Lane-dense channel tiling: 128-lane tiles when C allows it, otherwise a
    # single block over the whole channel dim (small-C case stays correct,
    # just lane-sparse; a token->lane repack would be needed to fully pack it).
    c_tile = 128 if (C % 128 == 0) else C
    num_c = C // c_tile

    # Halo rows so every tap slice stays in-bounds, rounded up to a sublane
    # multiple so the staging copy lands 8-aligned.
    P = max(8, ((c * side + c) + 7) // 8 * 8)

    # (C, 1, k, k) -> (k*k, C): tap-major, channels last (lanes)
    w_taps = jnp.transpose(weight[:, 0, :, :], (1, 2, 0)).reshape(k * k, C)
    b2d = bias.reshape(1, C)

    kernel = partial(_cpe_kernel, H=side, W=side, P=P, k=k)

    # Per grid step VMEM ~ (in + out, double-buffered) + scratch, each
    # N * c_tile elements -> a few MiB for PerViT shapes, well inside the
    # default scoped VMEM limit on v5e/v6e/v7x, so no vmem_limit override.
    return pl.pallas_call(
        kernel,
        out_shape=jax.ShapeDtypeStruct((B, N, C), x.dtype),
        grid_spec=pltpu.PrefetchScalarGridSpec(
            num_scalar_prefetch=0,
            grid=(B, num_c),
            in_specs=[
                pl.BlockSpec((1, N, c_tile), lambda b, cc: (b, 0, cc)),
                pl.BlockSpec((k * k, c_tile), lambda b, cc: (0, cc)),
                pl.BlockSpec((1, c_tile), lambda b, cc: (0, cc)),
            ],
            out_specs=pl.BlockSpec((1, N, c_tile), lambda b, cc: (b, 0, cc)),
            scratch_shapes=[pltpu.VMEM((P + N + P, c_tile), x.dtype)],
        ),
        compiler_params=pltpu.CompilerParams(
            dimension_semantics=("parallel", "parallel")),
    )(x, w_taps, b2d)


def cpe_reference(x, weight, bias, k=3):
    """Pure-JAX reference (shift-and-accumulate depthwise conv)."""
    B, N, C = x.shape
    side = int(math.sqrt(N))
    pad = k // 2
    x_img = x.reshape(B, side, side, C)
    x_pad = jnp.pad(x_img, ((0, 0), (pad, pad), (pad, pad), (0, 0)))
    out = jnp.zeros((B, side, side, C), jnp.float32)
    for dy in range(k):
        for dx in range(k):
            tap = x_pad[:, dy:dy + side, dx:dx + side, :].astype(jnp.float32)
            w = weight[:, 0, dy, dx].astype(jnp.float32)  # (C,)
            out = out + tap * w
    out = out + bias.astype(jnp.float32)
    return out.reshape(B, N, C).astype(x.dtype)


if __name__ == "__main__":
    key = jax.random.PRNGKey(0)
    kk = 3

    # Small module-consistent config + a lane-dense, channel-tiled config.
    for (B, side, C) in [(2, 8, 4), (2, 8, 256)]:
        key, k_x, k_w, k_b = jax.random.split(key, 4)
        N = side * side
        x = jax.random.normal(k_x, (B, N, C), dtype=jnp.float32)
        # Deterministic init of Conv2d(dim, dim, k, 1, k//2, groups=dim):
        fan_in = 1 * kk * kk
        bound = 1.0 / math.sqrt(fan_in)
        weight = jax.random.uniform(k_w, (C, 1, kk, kk), jnp.float32,
                                    -bound, bound)
        bias = jax.random.uniform(k_b, (C,), jnp.float32, -bound, bound)

        out = jax.block_until_ready(cpe_forward(x, weight, bias, k=kk))
        ref = cpe_reference(x, weight, bias, k=kk)
        assert out.shape == (B, N, C)
        assert jnp.allclose(out, ref, atol=1e-5, rtol=1e-5), \
            f"mismatch vs reference for (B, side, C)={(B, side, C)}"

    print("KERNEL_OK")
</pallas_src>

<mosaic_0001>
module attributes {stable_mosaic.version = 11 : i64} {
  func.func @_cpe_kernel(%arg0: i32, %arg1: i32, %arg2: memref<1x64x4xf32, #tpu.memory_space<vmem>>, %arg3: memref<9x4xf32, #tpu.memory_space<vmem>>, %arg4: memref<1x4xf32, #tpu.memory_space<vmem>>, %arg5: memref<1x64x4xf32, #tpu.memory_space<vmem>>, %arg6: memref<96x4xf32, #tpu.memory_space<vmem>>) attributes {dimension_semantics = [#tpu.dimension_semantics<parallel>, #tpu.dimension_semantics<parallel>], iteration_bounds = array<i64: 2, 1>, scalar_prefetch = 0 : i64, scratch_operands = 1 : i64, tpu.core_type = #tpu.core_type<tc>, window_params = [{transform_indices = @transform_0, window_bounds = array<i64: 1, 64, 4>}, {transform_indices = @transform_1, window_bounds = array<i64: 9, 4>}, {transform_indices = @transform_2, window_bounds = array<i64: 1, 4>}, {transform_indices = @transform_3, window_bounds = array<i64: 1, 64, 4>}]} {
    %cst = arith.constant 0.000000e+00 : f32
    %0 = vector.broadcast %cst : f32 to vector<16x4xf32>
    %c0 = arith.constant 0 : index
    %c0_0 = arith.constant 0 : index
    %1 = vector.load %arg6[%c0, %c0_0] : memref<96x4xf32, #tpu.memory_space<vmem>>, vector<16x4xf32>
    tpu.vector_store %arg6[%c0, %c0_0], %0 {strides = array<i32>} : memref<96x4xf32, #tpu.memory_space<vmem>>, vector<16x4xf32>,
    %c80 = arith.constant 80 : index
    %c0_1 = arith.constant 0 : index
    %2 = vector.load %arg6[%c80, %c0_1] : memref<96x4xf32, #tpu.memory_space<vmem>>, vector<16x4xf32>
    tpu.vector_store %arg6[%c80, %c0_1], %0 {strides = array<i32>} : memref<96x4xf32, #tpu.memory_space<vmem>>, vector<16x4xf32>,
    %c0_2 = arith.constant 0 : index
    %c0_3 = arith.constant 0 : index
    %c0_4 = arith.constant 0 : index
    %3 = vector.load %arg2[%c0_2, %c0_3, %c0_4] : memref<1x64x4xf32, #tpu.memory_space<vmem>>, vector<1x64x4xf32>
    %4 = vector.shape_cast %3 : vector<1x64x4xf32> to vector<64x4xf32>
    %c16 = arith.constant 16 : index
    %c0_5 = arith.constant 0 : index
    %5 = vector.load %arg6[%c16, %c0_5] : memref<96x4xf32, #tpu.memory_space<vmem>>, vector<64x4xf32>
    tpu.vector_store %arg6[%c16, %c0_5], %4 {strides = array<i32>} : memref<96x4xf32, #tpu.memory_space<vmem>>, vector<64x4xf32>,
    %6 = tpu.iota {dimensions = array<i32: 0>} : vector<64x1xi32>
    %c8_i32 = arith.constant 8 : i32
    %c0_i32 = arith.constant 0 : i32
    %7 = arith.cmpi eq, %c8_i32, %c0_i32 : i32
    %c1_i32 = arith.constant 1 : i32
    %8 = arith.select %7, %c1_i32, %c8_i32 : i32
    %9 = vector.broadcast %8 : i32 to vector<64x1xi32>
    %10 = arith.remsi %6, %9 : vector<64x1xi32>
    %c0_i32_6 = arith.constant 0 : i32
    %11 = vector.broadcast %c0_i32_6 : i32 to vector<64x1xi32>
    %12 = arith.cmpi ne, %10, %11 : vector<64x1xi32>
    %c0_i32_7 = arith.constant 0 : i32
    %13 = vector.broadcast %c0_i32_7 : i32 to vector<64x1xi32>
    %14 = arith.cmpi slt, %10, %13 : vector<64x1xi32>
    %c0_i32_8 = arith.constant 0 : i32
    %15 = arith.cmpi slt, %8, %c0_i32_8 : i32
    %16 = vector.broadcast %15 : i1 to vector<64x1xi1>
    %17 = vector.broadcast %16 : vector<64x1xi1> to vector<64x1xi1>
    %18 = arith.xori %14, %17 : vector<64x1xi1>
    %19 = arith.andi %18, %12 : vector<64x1xi1>
    %20 = vector.broadcast %8 : i32 to vector<64x1xi32>
    %21 = arith.addi %10, %20 : vector<64x1xi32>
    %22 = arith.select %19, %21, %10 : vector<64x1xi1>, vector<64x1xi32>
    %c1_i32_9 = arith.constant 1 : i32
    %23 = vector.broadcast %c1_i32_9 : i32 to vector<64x1xi32>
    %24 = arith.cmpi sge, %22, %23 : vector<64x1xi32>
    %c7_i32 = arith.constant 7 : i32
    %25 = vector.broadcast %c7_i32 : i32 to vector<64x1xi32>
    %26 = arith.cmpi slt, %22, %25 : vector<64x1xi32>
    %c0_10 = arith.constant 0 : index
    %c0_11 = arith.constant 0 : index
    %27 = vector.load %arg3[%c0_10, %c0_11] : memref<9x4xf32, #tpu.memory_space<vmem>>, vector<9x4xf32>
    %c0_12 = arith.constant 0 : index
    %c0_13 = arith.constant 0 : index
    %28 = vector.load %arg4[%c0_12, %c0_13] : memref<1x4xf32, #tpu.memory_space<vmem>>, vector<1x4xf32>
    %29 = vector.extract_strided_slice %27 {offsets = [4, 0], sizes = [1, 4], strides = [1, 1]} : vector<9x4xf32> to vector<1x4xf32>
    %30 = vector.broadcast %29 : vector<1x4xf32> to vector<64x4xf32>
    %31 = arith.mulf %4, %30 : vector<64x4xf32>
    %32 = vector.broadcast %28 : vector<1x4xf32> to vector<64x4xf32>
    %33 = arith.addf %31, %32 : vector<64x4xf32>
    %c7 = arith.constant 7 : index
    %c0_14 = arith.constant 0 : index
    %34 = vector.load %arg6[%c7, %c0_14] : memref<96x4xf32, #tpu.memory_space<vmem>>, vector<64x4xf32>
    %cst_15 = arith.constant 0.000000e+00 : f32
    %35 = vector.shape_cast %24 : vector<64x1xi1> to vector<64x1xi1>
    %36 = vector.broadcast %35 : vector<64x1xi1> to vector<64x4xi1>
    %37 = vector.broadcast %cst_15 : f32 to vector<64x4xf32>
    %38 = arith.select %36, %34, %37 : vector<64x4xi1>, vector<64x4xf32>
    %39 = vector.extract_strided_slice %27 {offsets = [0, 0], sizes = [1, 4], strides = [1, 1]} : vector<9x4xf32> to vector<1x4xf32>
    %40 = vector.broadcast %39 : vector<1x4xf32> to vector<64x4xf32>
    %41 = arith.mulf %38, %40 : vector<64x4xf32>
    %42 = arith.addf %33, %41 : vector<64x4xf32>
    %c8 = arith.constant 8 : index
    %c0_16 = arith.constant 0 : index
    %43 = vector.load %arg6[%c8, %c0_16] : memref<96x4xf32, #tpu.memory_space<vmem>>, vector<64x4xf32>
    %44 = vector.extract_strided_slice %27 {offsets = [1, 0], sizes = [1, 4], strides = [1, 1]} : vector<9x4xf32> to vector<1x4xf32>
    %45 = vector.broadcast %44 : vector<1x4xf32> to vector<64x4xf32>
    %46 = arith.mulf %43, %45 : vector<64x4xf32>
    %47 = arith.addf %42, %46 : vector<64x4xf32>
    %c9 = arith.constant 9 : index
    %c0_17 = arith.constant 0 : index
    %48 = vector.load %arg6[%c9, %c0_17] : memref<96x4xf32, #tpu.memory_space<vmem>>, vector<64x4xf32>
    %cst_18 = arith.constant 0.000000e+00 : f32
    %49 = vector.shape_cast %26 : vector<64x1xi1> to vector<64x1xi1>
    %50 = vector.broadcast %49 : vector<64x1xi1> to vector<64x4xi1>
    %51 = vector.broadcast %cst_18 : f32 to vector<64x4xf32>
    %52 = arith.select %50, %48, %51 : vector<64x4xi1>, vector<64x4xf32>
    %53 = vector.extract_strided_slice %27 {offsets = [2, 0], sizes = [1, 4], strides = [1, 1]} : vector<9x4xf32> to vector<1x4xf32>
    %54 = vector.broadcast %53 : vector<1x4xf32> to vector<64x4xf32>
    %55 = arith.mulf %52, %54 : vector<64x4xf32>
    %56 = arith.addf %47, %55 : vector<64x4xf32>
    %c15 = arith.constant 15 : index
    %c0_19 = arith.constant 0 : index
    %57 = vector.load %arg6[%c15, %c0_19] : memref<96x4xf32, #tpu.memory_space<vmem>>, vector<64x4xf32>
    %cst_20 = arith.constant 0.000000e+00 : f32
    %58 = vector.shape_cast %24 : vector<64x1xi1> to vector<64x1xi1>
    %59 = vector.broadcast %58 : vector<64x1xi1> to vector<64x4xi1>
    %60 = vector.broadcast %cst_20 : f32 to vector<64x4xf32>
    %61 = arith.select %59, %57, %60 : vector<64x4xi1>, vector<64x4xf32>
    %62 = vector.extract_strided_slice %27 {offsets = [3, 0], sizes = [1, 4], strides = [1, 1]} : vector<9x4xf32> to vector<1x4xf32>
    %63 = vector.broadcast %62 : vector<1x4xf32> to vector<64x4xf32>
    %64 = arith.mulf %61, %63 : vector<64x4xf32>
    %65 = arith.addf %56, %64 : vector<64x4xf32>
    %c17 = arith.constant 17 : index
    %c0_21 = arith.constant 0 : index
    %66 = vector.load %arg6[%c17, %c0_21] : memref<96x4xf32, #tpu.memory_space<vmem>>, vector<64x4xf32>
    %cst_22 = arith.constant 0.000000e+00 : f32
    %67 = vector.shape_cast %26 : vector<64x1xi1> to vector<64x1xi1>
    %68 = vector.broadcast %67 : vector<64x1xi1> to vector<64x4xi1>
    %69 = vector.broadcast %cst_22 : f32 to vector<64x4xf32>
    %70 = arith.select %68, %66, %69 : vector<64x4xi1>, vector<64x4xf32>
    %71 = vector.extract_strided_slice %27 {offsets = [5, 0], sizes = [1, 4], strides = [1, 1]} : vector<9x4xf32> to vector<1x4xf32>
    %72 = vector.broadcast %71 : vector<1x4xf32> to vector<64x4xf32>
    %73 = arith.mulf %70, %72 : vector<64x4xf32>
    %74 = arith.addf %65, %73 : vector<64x4xf32>
    %c23 = arith.constant 23 : index
    %c0_23 = arith.constant 0 : index
    %75 = vector.load %arg6[%c23, %c0_23] : memref<96x4xf32, #tpu.memory_space<vmem>>, vector<64x4xf32>
    %cst_24 = arith.constant 0.000000e+00 : f32
    %76 = vector.shape_cast %24 : vector<64x1xi1> to vector<64x1xi1>
    %77 = vector.broadcast %76 : vector<64x1xi1> to vector<64x4xi1>
    %78 = vector.broadcast %cst_24 : f32 to vector<64x4xf32>
    %79 = arith.select %77, %75, %78 : vector<64x4xi1>, vector<64x4xf32>
    %80 = vector.extract_strided_slice %27 {offsets = [6, 0], sizes = [1, 4], strides = [1, 1]} : vector<9x4xf32> to vector<1x4xf32>
    %81 = vector.broadcast %80 : vector<1x4xf32> to vector<64x4xf32>
    %82 = arith.mulf %79, %81 : vector<64x4xf32>
    %83 = arith.addf %74, %82 : vector<64x4xf32>
    %c24 = arith.constant 24 : index
    %c0_25 = arith.constant 0 : index
    %84 = vector.load %arg6[%c24, %c0_25] : memref<96x4xf32, #tpu.memory_space<vmem>>, vector<64x4xf32>
    %85 = vector.extract_strided_slice %27 {offsets = [7, 0], sizes = [1, 4], strides = [1, 1]} : vector<9x4xf32> to vector<1x4xf32>
    %86 = vector.broadcast %85 : vector<1x4xf32> to vector<64x4xf32>
    %87 = arith.mulf %84, %86 : vector<64x4xf32>
    %88 = arith.addf %83, %87 : vector<64x4xf32>
    %c25 = arith.constant 25 : index
    %c0_26 = arith.constant 0 : index
    %89 = vector.load %arg6[%c25, %c0_26] : memref<96x4xf32, #tpu.memory_space<vmem>>, vector<64x4xf32>
    %cst_27 = arith.constant 0.000000e+00 : f32
    %90 = vector.shape_cast %26 : vector<64x1xi1> to vector<64x1xi1>
    %91 = vector.broadcast %90 : vector<64x1xi1> to vector<64x4xi1>
    %92 = vector.broadcast %cst_27 : f32 to vector<64x4xf32>
    %93 = arith.select %91, %89, %92 : vector<64x4xi1>, vector<64x4xf32>
    %94 = vector.extract_strided_slice %27 {offsets = [8, 0], sizes = [1, 4], strides = [1, 1]} : vector<9x4xf32> to vector<1x4xf32>
    %95 = vector.broadcast %94 : vector<1x4xf32> to vector<64x4xf32>
    %96 = arith.mulf %93, %95 : vector<64x4xf32>
    %97 = arith.addf %88, %96 : vector<64x4xf32>
    %c0_28 = arith.constant 0 : index
    %c0_29 = arith.constant 0 : index
    %c0_30 = arith.constant 0 : index
    %98 = vector.load %arg5[%c0_28, %c0_29, %c0_30] : memref<1x64x4xf32, #tpu.memory_space<vmem>>, vector<1x64x4xf32>
    %99 = vector.shape_cast %98 : vector<1x64x4xf32> to vector<64x4xf32>
    %100 = vector.shape_cast %97 : vector<64x4xf32> to vector<1x64x4xf32>
    tpu.vector_store %arg5[%c0_28, %c0_29, %c0_30], %100 {strides = array<i32>} : memref<1x64x4xf32, #tpu.memory_space<vmem>>, vector<1x64x4xf32>,
    return
  }
  func.func @transform_0(%arg0: i32, %arg1: i32) -> (i32, i32, i32) {
    %c0_i32 = arith.constant 0 : i32
    %c0_i32_0 = arith.constant 0 : i32
    return %arg0, %c0_i32, %arg1 : i32, i32, i32
  }
  func.func @transform_1(%arg0: i32, %arg1: i32) -> (i32, i32) {
    %c0_i32 = arith.constant 0 : i32
    %c0_i32_0 = arith.constant 0 : i32
    return %c0_i32, %arg1 : i32, i32
  }
  func.func @transform_2(%arg0: i32, %arg1: i32) -> (i32, i32) {
    %c0_i32 = arith.constant 0 : i32
    %c0_i32_0 = arith.constant 0 : i32
    return %c0_i32, %arg1 : i32, i32
  }
  func.func @transform_3(%arg0: i32, %arg1: i32) -> (i32, i32, i32) {
    %c0_i32 = arith.constant 0 : i32
    %c0_i32_0 = arith.constant 0 : i32
    return %arg0, %c0_i32, %arg1 : i32, i32, i32
  }
}

</mosaic_0001>

<bundles_post_ra>
// kernel: tpu_custom_call.1
= control target key start
LH: loop header
LB: loop body
LE: loop exit
PB: predicated region body
PF: predicated region fallthrough
CT: control target
= control target key end

     0   :  { %s880_s12 = smov 0   ;;  %s882_s13 = smov 0   ;;  %s1416_s0 = inlined_call_operand.vmem [shape: f32[2,64,4], index: 0, kind: input, shape index: {}]   ;;  %s1417_s1 = inlined_call_operand.vmem [shape: f32[9,4], index: 1, kind: input, shape index: {}]   ;;  %s1418_s2 = inlined_call_operand.vmem [shape: f32[1,4], index: 2, kind: input, shape index: {}]   ;;  %s1419_s3 = inlined_call_operand.vmem [shape: f32[2,64,4], index: 3, kind: output, shape index: {}]  }
   0x1   :  { %s884_s14 = smov 0  }
   0x2 LB: > { %s25_s15 = sadd.s32 1, %s853_s13  ;;  %p799_p0 = scmp.ge.s32.totalorder %s857_s14, 1  ;;  %s857_s14 = sphi %s884_s14, %s13_s14   ;;  %s853_s13 = sphi %s882_s13, %s1466_s13   ;;  %s849_s12 = sphi %s880_s12, %s1465_s12  }
   0x3   : > { %p27_p1 = scmp.ge.s32.totalorder %s25_s15, 2  ;;  %p173_p2 = scmp.lt.s32.totalorder %s857_s14, 3 }
   0x5   : > { %s1468_s15 = smov (%p27_p1, %s25_s15), 0  ;;  %p174_p3 = pnand %p799_p0, %p173_p2 }
   0x6   : > { %p210_p4 = scmp.lt.s32.totalorder (!%p174_p3), %s849_s12, 1 }
   0x7   : > { %177 = sbr.rel (%p174_p3) target bundleno = 84 (0x54), region = 32 }
   0xc   : > { %vm233_vm0 = vcmask 31744   ;;  %v254_v0 = vlaneseq  ;;  %v859_v1 = vmov 0.0   ;;  %s1470_s12 = smov (!%p210_p4, %s849_s12), 1  ;;  %v909_v3 = vld [vmem:[%s1417_s1] sm:$0xff] }
   0xd   : > { %234 = vst.msk [vmem:[#allocation2] sm:$0xff] %vm233_vm0, %v859_v1  ;;  %235 = vst.msk [vmem:[#allocation2 + $0x8] sm:$0xff] %vm233_vm0, %v859_v1  ;;  %s808_s18 = sshll.u32 %s1470_s12, 6  ;;  %v926_v8 = vld [vmem:[%s1418_s2] ss:$0 sm:$0xff] }
   0xe   : > { %236 = vst.msk [vmem:[#allocation2 + $0x50] sm:$0xff] %vm233_vm0, %v859_v1  ;;  %237 = vst.msk [vmem:[#allocation2 + $0x58] sm:$0xff] %vm233_vm0, %v859_v1  ;;  %v904_v2 = vshrl.u32 %v254_v0, 7  ;;  %s921_s21 = scalar_lea.vmem %s1416_s0, %s808_s18  ;;  %s1266_s28 = scalar_lea.vmem %s1419_s3, %s808_s18 }
   0xf   : > { %v238_v12 = vld [vmem:[%s921_s21] sm:$0xff]  ;;  %v239_v16 = vld [vmem:[%s921_s21 + $0x8] sm:$0xff]  ;;  %v240_v18 = vld [vmem:[%s921_s21 + $0x10] sm:$0xff] }
  0x10   : > { %v267_v4 = vand.u32 7, %v904_v2  ;;  %v380_v5 = vsub.s32 4, %v904_v2  ;;  %v438_v6 = vsub.s32 0, %v904_v2  ;;  %v466_v7 = vsub.s32 1, %v904_v2  ;;  %246 = vst.msk [vmem:[#allocation2 + $0x10] sm:$0xff] %vm233_vm0, %v238_v12  ;;  %247 = vst.msk [vmem:[#allocation2 + $0x18] sm:$0xff] %vm233_vm0, %v239_v16 }
  0x11   : > { %v929_v9 = vadd.s32 8, %v904_v2  ;;  %v932_v10 = vadd.s32 16, %v904_v2  ;;  %v935_v11 = vadd.s32 24, %v904_v2  ;;  %v547_v17 = vsub.s32 3, %v904_v2  ;;  %248 = vst.msk [vmem:[#allocation2 + $0x20] sm:$0xff] %vm233_vm0, %v240_v18  ;;  %v241_v21 = vld [vmem:[%s921_s21 + $0x18] sm:$0xff] }
  0x12   : > { %vm940_vm1 = vcmp.ge.s32.totalorder %v267_v4, 1  ;;  %v945_v14 = vrot.slane %v909_v3, %v380_v5  ;;  %v948_v15 = vrot.slane %v909_v3, %v438_v6  ;;  %v955_v19 = vrot.slane %v909_v3, %v466_v7  ;;  %v242_v22 = vld [vmem:[%s921_s21 + $0x20] sm:$0xff]  ;;  %v243_v23 = vld [vmem:[%s921_s21 + $0x28] sm:$0xff]  ;;  %249 = vst.msk [vmem:[#allocation2 + $0x28] sm:$0xff] %vm233_vm0, %v241_v21  ;;  %v244_v29 = vld [vmem:[%s921_s21 + $0x30] sm:$0xff] }
  0x13   : > { %v274_v20 = vand.u32 7, %v929_v9  ;;  %v281_v28 = vand.u32 7, %v932_v10  ;;  %250 = vst.msk [vmem:[#allocation2 + $0x30] sm:$0xff] %vm233_vm0, %v242_v22  ;;  %251 = vst.msk [vmem:[#allocation2 + $0x38] sm:$0xff] %vm233_vm0, %v243_v23  ;;  %v1424_v32 = vand.u32 7, %v935_v11  ;;  %v976_v33 = vld [vmem:[%s921_s21 + $0x38] sm:$0xff]  ;;  %v981_v36 = vrot.slane %v909_v3, %v547_v17 }
  0x14   : > { %v382_v24 = vmul.f32 %v945_v14, %v238_v12  ;;  %v404_v25 = vld [vmem:[#allocation2 + $0x7] sm:$0xff]  ;;  %v383_v27 = vmul.f32 %v945_v14, %v239_v16  ;;  %v384_v31 = vmul.f32 %v945_v14, %v240_v18  ;;  %252 = vst.msk [vmem:[#allocation2 + $0x40] sm:$0xff] %vm233_vm0, %v244_v29  ;;  %v385_v37 = vmul.f32 %v945_v14, %v241_v21 }
  0x15   : > { %v456_v26 = vld [vmem:[#allocation2 + $0x8] sm:$0xff]  ;;  %v428_v30 = vsel %vm940_vm1, %v404_v25, 0.0  ;;  %253 = vst.msk [vmem:[#allocation2 + $0x48] sm:$0xff] %vm233_vm0, %v976_v33  ;;  %vm989_vm2 = vcmp.ge.s32.totalorder %v274_v20, 1  ;;  %v994_v40 = vadd.s32 32, %v904_v2  ;;  %v386_v41 = vmul.f32 %v945_v14, %v242_v22 }
  0x16   : > { %v396_v34 = vadd.f32 %v926_v8, %v382_v24  ;;  %v440_v35 = vmul.f32 %v948_v15, %v428_v30  ;;  %v468_v38 = vmul.f32 %v955_v19, %v456_v26  ;;  %v397_v43 = vadd.f32 %v926_v8, %v383_v27 }
  0x17   : > { %vm1000_vm3 = vcmp.ge.s32.totalorder %v281_v28, 1  ;;  %v1005_v45 = vadd.s32 40, %v904_v2  ;;  %v398_v46 = vadd.f32 %v926_v8, %v384_v31  ;;  %vm1010_vm4 = vcmp.ge.s32.totalorder %v1424_v32, 1  ;;  %v405_v50 = vld [vmem:[#allocation2 + $0xf] sm:$0xff]  ;;  %v1018_v52 = vld [vmem:[#allocation2 + $0x17] sm:$0xff] }
  0x18   : > { %v448_v42 = vadd.f32 %v440_v35, %v396_v34  ;;  %v387_v48 = vmul.f32 %v945_v14, %v243_v23  ;;  %v1016_v49 = vadd.s32 48, %v904_v2  ;;  %v457_v51 = vld [vmem:[#allocation2 + $0x10] sm:$0xff]  ;;  %v399_v53 = vadd.f32 %v926_v8, %v385_v37  ;;  %v1029_v59 = vld [vmem:[#allocation2 + $0x1f] sm:$0xff] }
  0x19   : > { %v1423_v54 = vand.u32 7, %v994_v40  ;;  %v400_v55 = vadd.f32 %v926_v8, %v386_v41  ;;  %v388_v56 = vmul.f32 %v945_v14, %v244_v29  ;;  %v429_v57 = vsel %vm989_vm2, %v405_v50, 0.0  ;;  %v1041_v5 = vld [vmem:[#allocation2 + $0x18] sm:$0xff]  ;;  %v1043_v6 = vld [vmem:[#allocation2 + $0x27] sm:$0xff] }
  0x1a   : > { %v430_v58 = vsel %vm1000_vm3, %v1018_v52, 0.0  ;;  %v1422_v60 = vand.u32 7, %v1005_v45  ;;  %v1033_v61 = vadd.s32 56, %v904_v2  ;;  %v1035_v62 = vadd.f32 %v468_v38, %v448_v42  ;;  %v1049_v16 = vld [vmem:[#allocation2 + $0x20] sm:$0xff]  ;;  %v1060_v25 = vld [vmem:[#allocation2 + $0x28] sm:$0xff]  ;;  %v1087_v41 = vld [vmem:[#allocation2 + $0x30] sm:$0xff] }
  0x1b   : > { %v441_v63 = vmul.f32 %v948_v15, %v429_v57  ;;  %v537_v0 = vsel %vm940_vm1, %v405_v50, 0.0  ;;  %v442_v1 = vmul.f32 %v948_v15, %v430_v58  ;;  %v469_v7 = vmul.f32 %v955_v19, %v457_v51  ;;  %v1062_v26 = vld [vmem:[#allocation2 + $0x2f] sm:$0xff]  ;;  %v1089_v42 = vld [vmem:[#allocation2 + $0x37] sm:$0xff] }
  0x1c   : > { %v431_v12 = vsel %vm1010_vm4, %v1029_v59, 0.0  ;;  %v401_v17 = vadd.f32 %v926_v8, %v387_v48  ;;  %v1420_v18 = vand.u32 7, %v1016_v49  ;;  %vm1056_vm5 = vcmp.ge.s32.totalorder %v1423_v54, 1  ;;  %v486_v54 = vld [vmem:[#allocation2 + $0x19] sm:$0xff] }
  0x1d   : > { %v449_v21 = vadd.f32 %v441_v63, %v397_v43  ;;  %v450_v22 = vadd.f32 %v442_v1, %v398_v46  ;;  %v443_v23 = vmul.f32 %v948_v15, %v431_v12  ;;  %v1065_v27 = vmul.f32 %v981_v36, %v537_v0  ;;  %v1107_v63 = vld [vmem:[#allocation2 + $0x38] sm:$0xff] }
  0x1e   : > { %v470_v29 = vmul.f32 %v955_v19, %v1041_v5  ;;  %v432_v30 = vsel %vm1056_vm5, %v1043_v6, 0.0  ;;  %vm1074_vm6 = vcmp.ge.s32.totalorder %v1422_v60, 1  ;;  %v538_v34 = vsel %vm989_vm2, %v1018_v52, 0.0  ;;  %v490_v47 = vld [vmem:[#allocation2 + $0x39] sm:$0xff] }
  0x1f   : > { %v471_v35 = vmul.f32 %v955_v19, %v1049_v16  ;;  %v539_v37 = vsel %vm1000_vm3, %v1029_v59, 0.0  ;;  %v444_v38 = vmul.f32 %v948_v15, %v432_v30  ;;  %v451_v43 = vadd.f32 %v443_v23, %v399_v53  ;;  %v1125_v30 = vld [vmem:[#allocation2 + $0x40] sm:$0xff] }
  0x20   : > { %v472_v46 = vmul.f32 %v955_v19, %v1060_v25  ;;  %v433_v48 = vsel %vm1074_vm6, %v1062_v26, 0.0  ;;  %vm1098_vm7 = vcmp.ge.s32.totalorder %v1420_v18, 1  ;;  %v477_v51 = vadd.f32 %v469_v7, %v449_v21  ;;  %v1116_v21 = vld [vmem:[#allocation2 + $0x3f] sm:$0xff] }
  0x21   : > { %v1102_v57 = vadd.f32 %v470_v29, %v450_v22  ;;  %v452_v58 = vadd.f32 %v444_v38, %v400_v55  ;;  %v445_v0 = vmul.f32 %v948_v15, %v433_v48  ;;  %v473_v1 = vmul.f32 %v955_v19, %v1087_v41 }
  0x22   : > { %v434_v12 = vsel %vm1098_vm7, %v1089_v42, 0.0  ;;  %v1421_v7 = vand.u32 7, %v1033_v61  ;;  %v402_v22 = vadd.f32 %v926_v8, %v388_v56  ;;  %v389_v29 = vmul.f32 %v945_v14, %v976_v33  ;;  %v484_v14 = vld [vmem:[#allocation2 + $0x9] sm:$0xff] }
  0x23   : > { %v446_v23 = vmul.f32 %v948_v15, %v434_v12  ;;  %v1127_v38 = vadd.f32 %v471_v35, %v451_v43  ;;  %v474_v48 = vmul.f32 %v955_v19, %v1107_v63  ;;  %vm1139_vm9 = vcmp.lt.s32.totalorder %v267_v4, 7 }
  0x24   : > { %vm1133_vm8 = vcmp.ge.s32.totalorder %v1421_v7, 1  ;;  %v1143_v33 = vadd.f32 %v472_v46, %v452_v58  ;;  %v403_v43 = vadd.f32 %v926_v8, %v389_v29  ;;  %v485_v7 = vld [vmem:[#allocation2 + $0x11] sm:$0xff]  ;;  %v453_v60 = vadd.f32 %v445_v0, %v401_v17  ;;  %v1169_v17 = vld [vmem:[%s1417_s1 + $0x8] ss:$0 sm:$0xff] }
  0x25   : > { %v435_v12 = vsel %vm1133_vm8, %v1116_v21, 0.0  ;;  %v475_v55 = vmul.f32 %v955_v19, %v1125_v30  ;;  %v518_v46 = vsub.s32 2, %v904_v2  ;;  %v454_v58 = vadd.f32 %v446_v23, %v402_v22 }
  0x26   : > { %v447_v4 = vmul.f32 %v948_v15, %v435_v12  ;;  %v508_v35 = vsel %vm1139_vm9, %v484_v14, 0.0  ;;  %v576_v8 = vsub.s32 5, %v904_v2  ;;  %v605_v29 = vsub.s32 6, %v904_v2  ;;  %v488_v14 = vld [vmem:[#allocation2 + $0x29] sm:$0xff] }
  0x27   : > { %v1161_v32 = vrot.slane %v909_v3, %v518_v46  ;;  %v566_v15 = vsel %vm1139_vm9, %v485_v7, 0.0  ;;  %v627_v19 = vsub.s32 7, %v904_v2  ;;  %v646_v23 = vsel %vm1139_vm9, %v486_v54, 0.0 }
  0x28   : > { %v455_v53 = vadd.f32 %v447_v4, %v403_v43  ;;  %v1172_v0 = vrot.slane %v909_v3, %v576_v8  ;;  %v1175_v22 = vrot.slane %v909_v3, %v605_v29  ;;  %vm1181_vm10 = vcmp.lt.s32.totalorder %v274_v20, 7  ;;  %v487_v8 = vld [vmem:[#allocation2 + $0x21] sm:$0xff] }
  0x29   : > { %v520_v2 = vmul.f32 %v1161_v32, %v508_v35  ;;  %v595_v43 = vsel %vm940_vm1, %v1018_v52, 0.0  ;;  %v1190_v12 = vrot.slane %v909_v3, %v627_v19  ;;  %v509_v4 = vsel %vm1181_vm10, %v485_v7, 0.0 }
  0x2a   : > { %v1194_v56 = vadd.f32 %v473_v1, %v453_v60  ;;  %v1196_v46 = vadd.f32 %v474_v48, %v454_v58  ;;  %v543_v9 = vsel %vm1098_vm7, %v1116_v21, 0.0  ;;  %v521_v20 = vmul.f32 %v1161_v32, %v509_v4 }
  0x2b   : > { %v1202_v35 = vadd.f32 %v475_v55, %v455_v53  ;;  %v528_v13 = vadd.f32 %v520_v2, %v1035_v62  ;;  %v658_v3 = vmul.f32 %v1169_v17, %v646_v23  ;;  %v567_v7 = vsel %vm1181_vm10, %v486_v54, 0.0 }
  0x2c   : > { %v578_v60 = vmul.f32 %v1172_v0, %v566_v15  ;;  %v607_v1 = vmul.f32 %v1175_v22, %v595_v43  ;;  %v529_v48 = vadd.f32 %v521_v20, %v477_v51  ;;  %v550_v53 = vmul.f32 %v981_v36, %v538_v34 }
  0x2d   : > { %v557_v55 = vadd.f32 %v1065_v27, %v528_v13  ;;  %v629_v62 = vmul.f32 %v1190_v12, %v1041_v5  ;;  %v596_v58 = vsel %vm989_vm2, %v1029_v59, 0.0  ;;  %vm1223_vm11 = vcmp.lt.s32.totalorder %v281_v28, 7 }
  0x2e   : > { %v558_v51 = vadd.f32 %v550_v53, %v529_v48  ;;  %v579_v52 = vmul.f32 %v1172_v0, %v567_v7  ;;  %v647_v34 = vsel %vm1181_vm10, %v487_v8, 0.0  ;;  %v510_v27 = vsel %vm1223_vm11, %v486_v54, 0.0 }
  0x2f   : > { %v586_v5 = vadd.f32 %v578_v60, %v557_v55  ;;  %v522_v15 = vmul.f32 %v1161_v32, %v510_v27  ;;  %v568_v39 = vsel %vm1223_vm11, %v487_v8, 0.0  ;;  %v597_v10 = vsel %vm1000_vm3, %v1043_v6, 0.0 }
  0x30   : > { %v587_v28 = vadd.f32 %v579_v52, %v558_v51  ;;  %v608_v19 = vmul.f32 %v1175_v22, %v596_v58  ;;  %v630_v23 = vmul.f32 %v1190_v12, %v1049_v16  ;;  %v551_v54 = vmul.f32 %v981_v36, %v539_v37 }
  0x31   : > { %v615_v2 = vadd.f32 %v607_v1, %v586_v5  ;;  %v659_v43 = vmul.f32 %v1169_v17, %v647_v34  ;;  %v530_v4 = vadd.f32 %v522_v15, %v1102_v57  ;;  %v1447_v20 = vand.u32 7, %v935_v11  ;;  %v489_v57 = vld [vmem:[#allocation2 + $0x31] sm:$0xff] }
  0x32   : > { %v616_v16 = vadd.f32 %v608_v19, %v587_v28  ;;  %v580_v7 = vmul.f32 %v1172_v0, %v568_v39  ;;  %v609_v44 = vmul.f32 %v1175_v22, %v597_v10  ;;  %v648_v1 = vsel %vm1223_vm11, %v488_v14, 0.0 }
  0x33   : > { %vm1250_vm12 = vcmp.lt.s32.totalorder %v1447_v20, 7  ;;  %v637_v37 = vadd.f32 %v629_v62, %v615_v2  ;;  %v559_v60 = vadd.f32 %v551_v54, %v530_v4  ;;  %v631_v53 = vmul.f32 %v1190_v12, %v1060_v25 }
  0x34   : > { %v511_v59 = vsel %vm1250_vm12, %v487_v8, 0.0  ;;  %v638_v48 = vadd.f32 %v630_v23, %v616_v16  ;;  %v1450_v8 = vsel %vm1010_vm4, %v1043_v6, 0.0  ;;  %v569_v62 = vsel %vm1250_vm12, %v488_v14, 0.0 }
  0x35   : > { %v523_v11 = vmul.f32 %v1161_v32, %v511_v59  ;;  %v552_v55 = vmul.f32 %v981_v36, %v1450_v8  ;;  %v666_v58 = vadd.f32 %v658_v3, %v637_v37  ;;  %v588_v29 = vadd.f32 %v580_v7, %v559_v60 }
  0x36   : > { %v598_v52 = vsel %vm1010_vm4, %v1062_v26, 0.0  ;;  %v667_v34 = vadd.f32 %v659_v43, %v638_v48  ;;  %v660_v25 = vmul.f32 %v1169_v17, %v648_v1  ;;  %v649_v6 = vsel %vm1250_vm12, %v489_v57, 0.0  ;;  %v491_v48 = vld [vmem:[#allocation2 + $0x41] sm:$0xff] }
  0x37   : > { %v531_v51 = vadd.f32 %v523_v11, %v1127_v38  ;;  %v1451_v27 = vand.u32 7, %v994_v40  ;;  %674 = vst.msk [vmem:[%s1266_s28] sm:$0xff] %vm233_vm0, %v666_v58  ;;  %v617_v3 = vadd.f32 %v609_v44, %v588_v29  ;;  %v581_v15 = vmul.f32 %v1172_v0, %v569_v62  ;;  %v536_v29 = vld [vmem:[#allocation2 + $0x47] sm:$0xff] }
  0x38   : > { %675 = vst.msk [vmem:[%s1266_s28 + $0x8] sm:$0xff] %vm233_vm0, %v667_v34  ;;  %v610_v10 = vmul.f32 %v1175_v22, %v598_v52  ;;  %v632_v40 = vmul.f32 %v1190_v12, %v1087_v41  ;;  %v661_v2 = vmul.f32 %v1169_v17, %v649_v6  ;;  %v599_v41 = vsel %vm1056_vm5, %v1089_v42, 0.0 }
  0x39   : > { %vm1286_vm13 = vcmp.lt.s32.totalorder %v1451_v27, 7  ;;  %v560_v38 = vadd.f32 %v552_v55, %v531_v51  ;;  %v639_v23 = vadd.f32 %v631_v53, %v617_v3  ;;  %v1455_v13 = vand.u32 7, %v1005_v45  ;;  %v565_v27 = vld [vmem:[#allocation2 + $0x49] sm:$0xff] }
  0x3a   : > { %v512_v39 = vsel %vm1286_vm13, %v488_v14, 0.0  ;;  %v570_v19 = vsel %vm1286_vm13, %v489_v57, 0.0  ;;  %v1454_v14 = vsel %vm1056_vm5, %v1062_v26, 0.0  ;;  %v650_v20 = vsel %vm1286_vm13, %v490_v47, 0.0 }
  0x3b   : > { %v524_v28 = vmul.f32 %v1161_v32, %v512_v39  ;;  %v589_v54 = vadd.f32 %v581_v15, %v560_v38  ;;  %v553_v43 = vmul.f32 %v981_v36, %v1454_v14  ;;  %vm1317_vm14 = vcmp.lt.s32.totalorder %v1455_v13, 7 }
  0x3c   : > { %v668_v7 = vadd.f32 %v660_v25, %v639_v23  ;;  %v582_v26 = vmul.f32 %v1172_v0, %v570_v19  ;;  %v633_v24 = vmul.f32 %v1190_v12, %v1107_v63  ;;  %v571_v45 = vsel %vm1317_vm14, %v490_v47, 0.0 }
  0x3d   : > { %v532_v4 = vadd.f32 %v524_v28, %v1143_v33  ;;  %v618_v44 = vadd.f32 %v610_v10, %v589_v54  ;;  %v513_v33 = vsel %vm1317_vm14, %v489_v57, 0.0  ;;  %v611_v1 = vmul.f32 %v1175_v22, %v599_v41  ;;  %v594_v54 = vld [vmem:[#allocation2 + $0x4f] sm:$0xff] }
  0x3e   : > { %v525_v37 = vmul.f32 %v1161_v32, %v513_v33  ;;  %676 = vst.msk [vmem:[%s1266_s28 + $0x10] sm:$0xff] %vm233_vm0, %v668_v7  ;;  %v662_v11 = vmul.f32 %v1169_v17, %v650_v20  ;;  %v1458_v57 = vsel %vm1074_vm6, %v1089_v42, 0.0  ;;  %v600_v55 = vsel %vm1074_vm6, %v1116_v21, 0.0  ;;  %v624_v33 = vld [vmem:[#allocation2 + $0x50] sm:$0xff] }
  0x3f   : > { %v561_v59 = vadd.f32 %v553_v43, %v532_v4  ;;  %v640_v60 = vadd.f32 %v632_v40, %v618_v44  ;;  %v554_v63 = vmul.f32 %v981_v36, %v1458_v57  ;;  %v1459_v62 = vand.u32 7, %v1016_v49  ;;  %v645_v44 = vld [vmem:[#allocation2 + $0x51] sm:$0xff] }
  0x40   : > { %v533_v8 = vadd.f32 %v525_v37, %v1194_v56  ;;  %v583_v42 = vmul.f32 %v1172_v0, %v571_v45  ;;  %v1462_v52 = vand.u32 7, %v1033_v61  ;;  %v612_v5 = vmul.f32 %v1175_v22, %v600_v55 }
  0x41   : > { %v590_v53 = vadd.f32 %v582_v26, %v561_v59  ;;  %vm1344_vm15 = vcmp.lt.s32.totalorder %v1459_v62, 7  ;;  %v669_v51 = vadd.f32 %v661_v2, %v640_v60  ;;  %v651_v61 = vsel %vm1317_vm14, %v491_v48, 0.0 }
  0x42   : > { %vm1351_vm1 = vcmp.lt.s32.totalorder %v1462_v52, 7  ;;  %v514_v31 = vsel %vm1344_vm15, %v490_v47, 0.0  ;;  %v562_v25 = vadd.f32 %v554_v63, %v533_v8  ;;  %v544_v3 = vsel %vm1133_vm8, %v536_v29, 0.0 }
  0x43   : > { %v619_v56 = vadd.f32 %v611_v1, %v590_v53  ;;  %v515_v49 = vsel %vm1351_vm1, %v491_v48, 0.0  ;;  %v526_v6 = vmul.f32 %v1161_v32, %v514_v31  ;;  %677 = vst.msk [vmem:[%s1266_s28 + $0x18] sm:$0xff] %vm233_vm0, %v669_v51  ;;  %v572_v38 = vsel %vm1344_vm15, %v491_v48, 0.0 }
  0x44   : > { %v591_v47 = vadd.f32 %v583_v42, %v562_v25  ;;  %v555_v10 = vmul.f32 %v981_v36, %v543_v9  ;;  %v634_v40 = vmul.f32 %v1190_v12, %v1125_v30  ;;  %v527_v28 = vmul.f32 %v1161_v32, %v515_v49  ;;  %v623_v9 = vld [vmem:[#allocation2 + $0x48] sm:$0xff] }
  0x45   : > { %v641_v15 = vadd.f32 %v633_v24, %v619_v56  ;;  %v534_v39 = vadd.f32 %v526_v6, %v1196_v46  ;;  %v573_v19 = vsel %vm1351_vm1, %v565_v27, 0.0  ;;  %v601_v23 = vsel %vm1098_vm7, %v536_v29, 0.0 }
  0x46   : > { %v620_v46 = vadd.f32 %v612_v5, %v591_v47  ;;  %v584_v43 = vmul.f32 %v1172_v0, %v572_v38  ;;  %v663_v21 = vmul.f32 %v1169_v17, %v651_v61  ;;  %v535_v4 = vadd.f32 %v527_v28, %v1202_v35 }
  0x47   : > { %v670_v2 = vadd.f32 %v662_v11, %v641_v15  ;;  %v563_v14 = vadd.f32 %v555_v10, %v534_v39  ;;  %v556_v30 = vmul.f32 %v981_v36, %v544_v3  ;;  %v613_v50 = vmul.f32 %v1175_v22, %v601_v23 }
  0x48   : > { %v642_v32 = vadd.f32 %v634_v40, %v620_v46  ;;  %v602_v20 = vsel %vm1133_vm8, %v594_v54, 0.0  ;;  %v585_v13 = vmul.f32 %v1172_v0, %v573_v19  ;;  %v652_v16 = vsel %vm1344_vm15, %v565_v27, 0.0 }
  0x49   : > { %678 = vst.msk [vmem:[%s1266_s28 + $0x20] sm:$0xff] %vm233_vm0, %v670_v2  ;;  %v592_v41 = vadd.f32 %v584_v43, %v563_v14  ;;  %v564_v7 = vadd.f32 %v556_v30, %v535_v4  ;;  %v635_v26 = vmul.f32 %v1190_v12, %v623_v9  ;;  %v614_v24 = vmul.f32 %v1175_v22, %v602_v20 }
  0x4a   : > { %v671_v35 = vadd.f32 %v663_v21, %v642_v32  ;;  %v664_v0 = vmul.f32 %v1169_v17, %v652_v16  ;;  %v653_v37 = vsel %vm1351_vm1, %v645_v44, 0.0  ;;  %v636_v60 = vmul.f32 %v1190_v12, %v624_v33 }
  0x4b   : > { %v621_v36 = vadd.f32 %v613_v50, %v592_v41  ;;  %v593_v59 = vadd.f32 %v585_v13, %v564_v7  ;;  %v665_v48 = vmul.f32 %v1169_v17, %v653_v37 }
  0x4c   : > { %679 = vst.msk [vmem:[%s1266_s28 + $0x28] sm:$0xff] %vm233_vm0, %v671_v35 }
  0x4d   : > { %v643_v18 = vadd.f32 %v635_v26, %v621_v36  ;;  %v622_v45 = vadd.f32 %v614_v24, %v593_v59 }
  0x4f   : > { %v672_v1 = vadd.f32 %v664_v0, %v643_v18  ;;  %v644_v11 = vadd.f32 %v636_v60, %v622_v45 }
  0x51   : > { %680 = vst.msk [vmem:[%s1266_s28 + $0x30] sm:$0xff] %vm233_vm0, %v672_v1  ;;  %v673_v57 = vadd.f32 %v665_v48, %v644_v11 }
  0x53   : > { %681 = vst.msk [vmem:[%s1266_s28 + $0x38] sm:$0xff] %vm233_vm0, %v673_v57 }
  0x54 PF: > { %s13_s14 = sadd.s32 1, %s857_s14   ;;  %s1465_s12 = smov %s853_s13 }
  0x55   : > { %p10_p5 = scmp.ge.s32.totalorder %s13_s14, 4   ;;  %s1466_s13 = smov %s1468_s15 }
  0x57   :  { %12 = sbr.rel (!%p10_p5) target bundleno = 2 (0x2), region = 68 }

</bundles_post_ra>
